<compile_context>
chip_gen: v6e
topology: v6e:2x2x1
jax: 0.10.0
libtpu: 0.0.40
codegen_flags: <defaults>
</compile_context>

<pallas_src>
import functools

import jax
import jax.numpy as jnp
from jax.experimental import pallas as pl
from jax.experimental.pallas import tpu as pltpu


def _amm_kernel(x_ref, w1_ref, b1_ref, w2_ref, b2_ref, o_ref, *, inv_hw):
    # x_ref / o_ref: (Nb, C, HWp) lane-dense block.
    # --- squeeze: streaming global-average-pool over the lane axis (f32 acc) ---
    sums = jnp.sum(x_ref[...], axis=-1, dtype=jnp.float32)          # (Nb, C)
    pooled = sums * inv_hw                                           # true 1/(H*W)

    # --- excite: tiny FC -> ReLU -> FC -> sigmoid, on VPU/XLU (no MXU) ---
    w1 = w1_ref[...]                                                 # (Cr, C)
    b1 = b1_ref[...]                                                 # (1, Cr)
    w2 = w2_ref[...]                                                 # (C, Cr)
    b2 = b2_ref[...]                                                 # (1, C)

    # h[n, j] = sum_c pooled[n, c] * w1[j, c]   (broadcast-mul + lane reduce)
    h = jnp.sum(pooled[:, None, :] * w1[None, :, :], axis=-1) + b1   # (Nb, Cr)
    h = jnp.maximum(h, 0.0)
    # a[n, c] = sum_j h[n, j] * w2[c, j]
    a = jnp.sum(h[:, None, :] * w2[None, :, :], axis=-1) + b2        # (Nb, C)
    attn = jax.nn.sigmoid(a)                                          # (Nb, C)

    # --- scale: re-read the tile and write directly (input dtype, no f32 copy) ---
    gain = attn[:, :, None].astype(o_ref.dtype)                      # (Nb, C, 1)
    o_ref[...] = (x_ref[...] * gain).astype(o_ref.dtype)


def _tpu_vmem_bytes():
    """Physical VMEM per TensorCore; conservative fallback = v7x (64 MiB)."""
    try:
        info = pltpu.get_tpu_info()
        v = getattr(info, "vmem_capacity_bytes", None)
        if v:
            return int(v)
    except Exception:
        pass
    return 64 * 1024 * 1024


def _num_tensorcores():
    """Best-effort TensorCore-per-chip count (v7x = 2, v5e/v6e = 1)."""
    try:
        info = pltpu.get_tpu_info()
        for name in ("num_cores", "core_count", "num_tensorcores",
                     "tensorcore_count"):
            v = getattr(info, name, None)
            if v:
                return int(v)
    except Exception:
        pass
    try:
        kind = jax.devices()[0].device_kind.lower()
        if "v7" in kind:
            return 2
    except Exception:
        pass
    return 1


def _choose_batch_block(N, C, HWp, itemsize, vmem_bytes, num_cores):
    """Largest batch block whose 2x(in)+2x(out) double-buffers fit ~40% of
    physical VMEM; on dual-TC chips keep >= num_cores grid steps (N >= 2)."""
    budget = int(0.40 * vmem_bytes)
    per_batch = C * HWp * itemsize
    cap = max(1, budget // (4 * per_batch))
    nb = max(1, min(N, cap))
    if num_cores >= 2 and N >= 2:
        nb = min(nb, max(1, -(-N // num_cores)))       # ceil(N / num_cores)
    return nb


def amm_forward(x, w1, b1, w2, b2):
    """x: (N, C, H, W).  Returns (N, C, H, W)."""
    N, C, H, W = x.shape
    HW = H * W
    Cr = w1.shape[0]
    itemsize = jnp.dtype(x.dtype).itemsize

    # Lane-dense layout: fold spatial dims at the HBM level (free reshape);
    # pad the spatial axis to a multiple of 128 so stores are unmasked vst.
    HWp = HW if HW % 128 == 0 else ((HW + 127) // 128) * 128
    x2 = x.reshape(N, C, HW)
    if HWp != HW:
        x2 = jnp.pad(x2, ((0, 0), (0, 0), (0, HWp - HW)))
    b1r = b1.reshape(1, Cr)
    b2r = b2.reshape(1, C)

    vmem_bytes = _tpu_vmem_bytes()
    num_cores = _num_tensorcores()
    Nb = _choose_batch_block(N, C, HWp, itemsize, vmem_bytes, num_cores)
    grid_steps = pl.cdiv(N, Nb)

    block_bytes = Nb * C * HWp * itemsize
    # Deeper pipelining only when blocks are forced small and there are enough
    # steps for a third buffer to hide DMA issue latency.
    use_deeper = (grid_steps >= 4
                  and block_bytes <= (1 << 20)
                  and 6 * block_bytes <= int(0.5 * vmem_bytes))
    if use_deeper:
        x_spec = pl.BlockSpec((Nb, C, HWp), lambda n: (n, 0, 0),
                              pipeline_mode=pl.Buffered(3))
    else:
        x_spec = pl.BlockSpec((Nb, C, HWp), lambda n: (n, 0, 0))

    weight_bytes = (Cr * C + C * Cr + Cr + C) * 4
    cost = pl.CostEstimate(
        flops=int(2 * N * C * HW + 4 * N * C * Cr + 2 * N * C),
        transcendentals=int(N * C),                       # sigmoid
        bytes_accessed=int(2 * N * C * HW * itemsize + weight_bytes),
    )

    kernel = functools.partial(_amm_kernel, inv_hw=float(1.0 / HW))

    out = pl.pallas_call(
        kernel,
        out_shape=jax.ShapeDtypeStruct((N, C, HWp), x.dtype),
        grid_spec=pl.GridSpec(
            grid=(grid_steps,),
            in_specs=[
                x_spec,
                pl.BlockSpec((Cr, C), lambda n: (0, 0)),   # weights stay resident
                pl.BlockSpec((1, Cr), lambda n: (0, 0)),
                pl.BlockSpec((C, Cr), lambda n: (0, 0)),
                pl.BlockSpec((1, C), lambda n: (0, 0)),
            ],
            out_specs=pl.BlockSpec((Nb, C, HWp), lambda n: (n, 0, 0)),
        ),
        compiler_params=pltpu.CompilerParams(
            dimension_semantics=("parallel",),
            vmem_limit_bytes=int(0.70 * vmem_bytes),
        ),
        cost_estimate=cost,
    )(x2, w1, b1r, w2, b2r)

    if HWp != HW:
        out = out[:, :, :HW]
    return out.reshape(N, C, H, W)


def amm_reference(x, w1, b1, w2, b2):
    pooled = jnp.mean(x, axis=(2, 3))                       # (N, C)
    h = jnp.maximum(pooled @ w1.T + b1[:, 0], 0.0)          # (N, Cr)
    attn = jax.nn.sigmoid(h @ w2.T + b2[:, 0])              # (N, C)
    return x * attn[:, :, None, None]


if __name__ == "__main__":
    N, C, H, W = 2, 32, 16, 16
    reduction_ratio = 16
    Cr = C // reduction_ratio

    key = jax.random.PRNGKey(0)
    kx, k1, k2, k3, k4 = jax.random.split(key, 5)

    x = jax.random.normal(kx, (N, C, H, W), dtype=jnp.float32)
    w1 = jax.random.normal(k1, (Cr, C), dtype=jnp.float32) * 0.1
    b1 = jax.random.normal(k2, (Cr, 1), dtype=jnp.float32) * 0.1
    w2 = jax.random.normal(k3, (C, Cr), dtype=jnp.float32) * 0.1
    b2 = jax.random.normal(k4, (C, 1), dtype=jnp.float32) * 0.1

    out = amm_forward(x, w1, b1, w2, b2)
    out = jax.block_until_ready(out)

    ref = amm_reference(x, w1, b1, w2, b2)
    assert jnp.allclose(out, ref, atol=1e-5, rtol=1e-5), "mismatch vs reference"

    print("KERNEL_OK")
</pallas_src>

<mosaic_0001>
module attributes {stable_mosaic.version = 11 : i64} {
  func.func @_amm_kernel(%arg0: i32, %arg1: memref<2x32x256xf32, #tpu.memory_space<vmem>>, %arg2: memref<2x32xf32, #tpu.memory_space<vmem>>, %arg3: memref<1x2xf32, #tpu.memory_space<vmem>>, %arg4: memref<32x2xf32, #tpu.memory_space<vmem>>, %arg5: memref<1x32xf32, #tpu.memory_space<vmem>>, %arg6: memref<2x32x256xf32, #tpu.memory_space<vmem>>) attributes {dimension_semantics = [#tpu.dimension_semantics<parallel>], iteration_bounds = array<i64: 1>, scalar_prefetch = 0 : i64, scratch_operands = 0 : i64, tpu.core_type = #tpu.core_type<tc>, window_params = [{transform_indices = @transform_0, window_bounds = array<i64: 2, 32, 256>}, {pipeline_mode = #tpu.pipeline_mode<synchronous>, transform_indices = @transform_1, window_bounds = array<i64: 2, 32>}, {pipeline_mode = #tpu.pipeline_mode<synchronous>, transform_indices = @transform_2, window_bounds = array<i64: 1, 2>}, {pipeline_mode = #tpu.pipeline_mode<synchronous>, transform_indices = @transform_3, window_bounds = array<i64: 32, 2>}, {pipeline_mode = #tpu.pipeline_mode<synchronous>, transform_indices = @transform_4, window_bounds = array<i64: 1, 32>}, {transform_indices = @transform_5, window_bounds = array<i64: 2, 32, 256>}]} {
    %c0 = arith.constant 0 : index
    %c0_0 = arith.constant 0 : index
    %c0_1 = arith.constant 0 : index
    %0 = vector.load %arg1[%c0, %c0_0, %c0_1] : memref<2x32x256xf32, #tpu.memory_space<vmem>>, vector<2x32x256xf32>
    %cst = arith.constant dense<0.000000e+00> : vector<2x32xf32>
    %1 = vector.multi_reduction <add>, %0, %cst [2] : vector<2x32x256xf32> to vector<2x32xf32>
    %cst_2 = arith.constant 3.906250e-03 : f32
    %2 = vector.broadcast %cst_2 : f32 to vector<2x32xf32>
    %3 = arith.mulf %1, %2 : vector<2x32xf32>
    %c0_3 = arith.constant 0 : index
    %c0_4 = arith.constant 0 : index
    %4 = vector.load %arg2[%c0_3, %c0_4] : memref<2x32xf32, #tpu.memory_space<vmem>>, vector<2x32xf32>
    %c0_5 = arith.constant 0 : index
    %c0_6 = arith.constant 0 : index
    %5 = vector.load %arg3[%c0_5, %c0_6] : memref<1x2xf32, #tpu.memory_space<vmem>>, vector<1x2xf32>
    %c0_7 = arith.constant 0 : index
    %c0_8 = arith.constant 0 : index
    %6 = vector.load %arg4[%c0_7, %c0_8] : memref<32x2xf32, #tpu.memory_space<vmem>>, vector<32x2xf32>
    %c0_9 = arith.constant 0 : index
    %c0_10 = arith.constant 0 : index
    %7 = vector.load %arg5[%c0_9, %c0_10] : memref<1x32xf32, #tpu.memory_space<vmem>>, vector<1x32xf32>
    %8 = vector.shape_cast %3 : vector<2x32xf32> to vector<2x1x32xf32>
    %9 = vector.shape_cast %4 : vector<2x32xf32> to vector<1x2x32xf32>
    %10 = vector.broadcast %8 : vector<2x1x32xf32> to vector<2x2x32xf32>
    %11 = vector.broadcast %9 : vector<1x2x32xf32> to vector<2x2x32xf32>
    %12 = arith.mulf %10, %11 : vector<2x2x32xf32>
    %cst_11 = arith.constant dense<0.000000e+00> : vector<2x2xf32>
    %13 = vector.multi_reduction <add>, %12, %cst_11 [2] : vector<2x2x32xf32> to vector<2x2xf32>
    %14 = vector.broadcast %5 : vector<1x2xf32> to vector<2x2xf32>
    %15 = arith.addf %13, %14 : vector<2x2xf32>
    %cst_12 = arith.constant 0.000000e+00 : f32
    %16 = vector.broadcast %cst_12 : f32 to vector<2x2xf32>
    %17 = arith.maximumf %15, %16 : vector<2x2xf32>
    %18 = vector.shape_cast %17 : vector<2x2xf32> to vector<2x1x2xf32>
    %19 = vector.shape_cast %6 : vector<32x2xf32> to vector<1x32x2xf32>
    %20 = vector.broadcast %18 : vector<2x1x2xf32> to vector<2x32x2xf32>
    %21 = vector.broadcast %19 : vector<1x32x2xf32> to vector<2x32x2xf32>
    %22 = arith.mulf %20, %21 : vector<2x32x2xf32>
    %cst_13 = arith.constant dense<0.000000e+00> : vector<2x32xf32>
    %23 = vector.multi_reduction <add>, %22, %cst_13 [2] : vector<2x32x2xf32> to vector<2x32xf32>
    %24 = vector.broadcast %7 : vector<1x32xf32> to vector<2x32xf32>
    %25 = arith.addf %23, %24 : vector<2x32xf32>
    %26 = arith.negf %25 : vector<2x32xf32>
    %27 = math.exp %26 : vector<2x32xf32>
    %cst_14 = arith.constant 1.000000e+00 : f32
    %28 = vector.broadcast %cst_14 : f32 to vector<2x32xf32>
    %29 = arith.addf %28, %27 : vector<2x32xf32>
    %30 = arith.divf %28, %29 : vector<2x32xf32>
    %31 = vector.shape_cast %30 : vector<2x32xf32> to vector<2x32x1xf32>
    %c0_15 = arith.constant 0 : index
    %c0_16 = arith.constant 0 : index
    %c0_17 = arith.constant 0 : index
    %32 = vector.load %arg1[%c0_15, %c0_16, %c0_17] : memref<2x32x256xf32, #tpu.memory_space<vmem>>, vector<2x32x256xf32>
    %33 = vector.broadcast %31 : vector<2x32x1xf32> to vector<2x32x256xf32>
    %34 = arith.mulf %32, %33 : vector<2x32x256xf32>
    %c0_18 = arith.constant 0 : index
    %c0_19 = arith.constant 0 : index
    %c0_20 = arith.constant 0 : index
    %35 = vector.load %arg6[%c0_18, %c0_19, %c0_20] : memref<2x32x256xf32, #tpu.memory_space<vmem>>, vector<2x32x256xf32>
    tpu.vector_store %arg6[%c0_18, %c0_19, %c0_20], %34 {strides = array<i32>} : memref<2x32x256xf32, #tpu.memory_space<vmem>>, vector<2x32x256xf32>,
    return
  }
  func.func @transform_0(%arg0: i32) -> (i32, i32, i32) {
    %c0_i32 = arith.constant 0 : i32
    %c0_i32_0 = arith.constant 0 : i32
    %c0_i32_1 = arith.constant 0 : i32
    return %arg0, %c0_i32, %c0_i32_0 : i32, i32, i32
  }
  func.func @transform_1(%arg0: i32) -> (i32, i32) {
    %c0_i32 = arith.constant 0 : i32
    %c0_i32_0 = arith.constant 0 : i32
    %c0_i32_1 = arith.constant 0 : i32
    return %c0_i32, %c0_i32_0 : i32, i32
  }
  func.func @transform_2(%arg0: i32) -> (i32, i32) {
    %c0_i32 = arith.constant 0 : i32
    %c0_i32_0 = arith.constant 0 : i32
    %c0_i32_1 = arith.constant 0 : i32
    return %c0_i32, %c0_i32_0 : i32, i32
  }
  func.func @transform_3(%arg0: i32) -> (i32, i32) {
    %c0_i32 = arith.constant 0 : i32
    %c0_i32_0 = arith.constant 0 : i32
    %c0_i32_1 = arith.constant 0 : i32
    return %c0_i32, %c0_i32_0 : i32, i32
  }
  func.func @transform_4(%arg0: i32) -> (i32, i32) {
    %c0_i32 = arith.constant 0 : i32
    %c0_i32_0 = arith.constant 0 : i32
    %c0_i32_1 = arith.constant 0 : i32
    return %c0_i32, %c0_i32_0 : i32, i32
  }
  func.func @transform_5(%arg0: i32) -> (i32, i32, i32) {
    %c0_i32 = arith.constant 0 : i32
    %c0_i32_0 = arith.constant 0 : i32
    %c0_i32_1 = arith.constant 0 : i32
    return %arg0, %c0_i32, %c0_i32_0 : i32, i32, i32
  }
}

</mosaic_0001>

<bundles_post_ra>
// kernel: tpu_custom_call.1
= control target key start
LH: loop header
LB: loop body
LE: loop exit
PB: predicated region body
PF: predicated region fallthrough
CT: control target
= control target key end

     0   :  { %10 = vsyncpa [#allocation3], 0  ;;  %s2069_s0 = inlined_call_operand.hbm [shape: f32[2,32,256], index: 0, kind: input, shape index: {}]   ;;  %s2070_s1 = inlined_call_operand.vmem [shape: f32[2,32], index: 1, kind: input, shape index: {}]   ;;  %s2071_s2 = inlined_call_operand.vmem [shape: f32[1,2], index: 2, kind: input, shape index: {}]   ;;  %s2072_s3 = inlined_call_operand.vmem [shape: f32[32,2], index: 3, kind: input, shape index: {}]   ;;  %s2073_s4 = inlined_call_operand.vmem [shape: f32[1,32], index: 4, kind: input, shape index: {}]   ;;  %s2074_s5 = inlined_call_operand.hbm [shape: f32[2,32,256], index: 5, kind: output, shape index: {}]  }
   0x1   :  { %11 = vsyncpa [#allocation4], 0  ;;  %s1535_s18 = smov [#allocation2]  }
   0x2   :  { %s17_s19 = sshll.u32 %s1535_s18, 4  ;;  %s18_s19 = int_to_ptr.vmem [resolvable:$true] %s17_s19 }
   0x3   :  { %s1499_s20 = scalar_lea.vmem %s18_s19, 2048  ;;  %p1504_p1 = scmp.lt.s32.totalorder %s18_s19, %s18_s19 }
   0x4   :  { %p1500_p0 = scmp.ne.s32.totalorder %s18_s19, %s1499_s20  ;;  %p1505_p2 = scmp.lt.s32.totalorder %s1499_s20, %s1499_s20 }
   0x6   :  { %p1506_p3 = por %p1505_p2, %p1504_p1 }
   0x8   :  { %p1507_p4 = pnand %p1506_p3, %p1500_p0 }
   0xa   :  { %1510 = shalt.err (!%p1507_p4)
}
   0xb   :  { %s1536_s21 = smov 256   ;;  %s1537_s22 = smov 16  }
   0xc   :  { %23 = dma.hbm_to_vmem [thread:$0]  %s2069_s0, 2048, %s18_s19, [#allocation3], %s1536_s21, %s1536_s21, %s1537_s22  }
   0xd   :  { %1531 = dma.done.wait [#allocation3], 2048  }
   0xe   :  { %1532 = vsyncadd [#allocation3], 4294965248  ;;  %v39_v0 = vld [vmem:[#allocation2 + $0x20] sm:$0xff]  ;;  %v40_v1 = vld [vmem:[#allocation2 + $0x28] sm:$0xff]  ;;  %v91_v24 = vlaneseq  ;;  %v1538_v29 = vmov 0   ;;  %vm228_vm0 = vcmask 130112  }
   0xf   :  { %v35_v2 = vld [vmem:[#allocation2] sm:$0xff]  ;;  %v57_v3 = vadd.f32 %v40_v1, %v39_v0  ;;  %v36_v4 = vld [vmem:[#allocation2 + $0x8] sm:$0xff]  ;;  %v41_v5 = vld [vmem:[#allocation2 + $0x30] sm:$0xff]  ;;  %1442 = vset.pattern.permute.xlu1 %v1538_v29  ;;  %1441 = vset.pattern.permute.xlu0 %v1538_v29  ;;  %vm235_vm1 = vcmask 195712   ;;  %vm242_vm2 = vcmask 261312   ;;  %vm301_vm3 = vcmask 1041409  }
  0x10   :  { %v42_v6 = vld [vmem:[#allocation2 + $0x38] sm:$0xff]  ;;  %v51_v7 = vadd.f32 %v36_v4, %v35_v2  ;;  %v37_v8 = vld [vmem:[#allocation2 + $0x10] sm:$0xff]  ;;  %v43_v14 = vld [vmem:[#allocation2 + $0x40] sm:$0xff]  ;;  %v1577_v25 = vshrl.u32 %v91_v24, 7  ;;  %vm306_vm4 = vcmask 254976   ;;  %vm1163_vm5 = vcmask 1042434  }
  0x11   :  { %v38_v9 = vld [vmem:[#allocation2 + $0x18] sm:$0xff]  ;;  %58 = vadd.xlane.f32.xlu1 %v57_v3  ;;  %v60_v10 = vadd.f32 %v42_v6, %v41_v5  ;;  %v45_v12 = vld [vmem:[#allocation2 + $0x50] sm:$0xff]  ;;  %v44_v15 = vld [vmem:[#allocation2 + $0x48] sm:$0xff]  ;;  %vm1165_vm6 = vcmask 1043459   ;;  %vm1167_vm7 = vcmask 1044484   ;;  %vm1169_vm8 = vcmask 1045509  }
  0x12   :  { %52 = vadd.xlane.f32.xlu0 %v51_v7  ;;  %v54_v11 = vadd.f32 %v38_v9, %v37_v8  ;;  %v46_v13 = vld [vmem:[#allocation2 + $0x58] sm:$0xff]  ;;  %v63_v17 = vadd.f32 %v44_v15, %v43_v14  ;;  %v49_v18 = vld [vmem:[#allocation2 + $0x70] sm:$0xff]  ;;  %v47_v20 = vld [vmem:[#allocation2 + $0x60] sm:$0xff]  ;;  %v1580_v26 = vsub.s32 0, %v1577_v25  ;;  %v1587_v30 = vsub.s32 1, %v1577_v25 }
  0x13   :  { %v66_v16 = vadd.f32 %v46_v13, %v45_v12  ;;  %v50_v19 = vld [vmem:[#allocation2 + $0x78] sm:$0xff]  ;;  %v48_v21 = vld [vmem:[#allocation2 + $0x68] sm:$0xff]  ;;  %v83_v27 = vld [vmem:[%s2070_s1] sm:$0x3]  ;;  %v1594_v33 = vsub.s32 2, %v1577_v25  ;;  %v1602_v37 = vsub.s32 4, %v1577_v25 }
  0x14   :  { %v72_v22 = vadd.f32 %v50_v19, %v49_v18  ;;  %v69_v23 = vadd.f32 %v48_v21, %v47_v20  ;;  %v94_v28 = vrot.slane %v83_v27, %v1580_v26  ;;  %v113_v31 = vrot.slane %v83_v27, %v1587_v30  ;;  %v85_v32 = vld [vmem:[%s2072_s3] sm:$0xff]  ;;  %v86_v45 = vld [vmem:[%s2072_s3 + $0x8] sm:$0xff]  ;;  %v87_v55 = vld [vmem:[%s2072_s3 + $0x10] sm:$0xff] }
  0x15   :  { %61 = vadd.xlane.f32.xlu1 %v60_v10  ;;  %v1426_v34 = vld [vmem:[%s2071_s2] ss:$0 sm:$0xff]  ;;  %v333_v35 = vrot.slane %v85_v32, %v1580_v26  ;;  %v347_v36 = vrot.slane %v85_v32, %v1594_v33  ;;  %v340_v38 = vrot.slane %v85_v32, %v1587_v30  ;;  %v353_v39 = vsub.s32 3, %v1577_v25  ;;  %v1640_v0 = vld [vmem:[%s2072_s3 + $0x18] sm:$0xff] }
  0x16   :  { %55 = vadd.xlane.f32.xlu0 %v54_v11  ;;  %v361_v40 = vrot.slane %v85_v32, %v1602_v37  ;;  %v1608_v41 = vsub.s32 6, %v1577_v25  ;;  %v1611_v43 = vsub.s32 5, %v1577_v25  ;;  %v1619_v47 = vsub.s32 7, %v1577_v25 }
  0x17   :  { %v354_v42 = vrot.slane %v85_v32, %v353_v39  ;;  %v389_v48 = vrot.slane %v86_v45, %v1580_v26  ;;  %v403_v50 = vrot.slane %v86_v45, %v1594_v33  ;;  %v396_v51 = vrot.slane %v86_v45, %v1587_v30 }
  0x18   :  { %v375_v44 = vrot.slane %v85_v32, %v1608_v41  ;;  %v368_v46 = vrot.slane %v85_v32, %v1611_v43  ;;  %v382_v49 = vrot.slane %v85_v32, %v1619_v47  ;;  %v417_v52 = vrot.slane %v86_v45, %v1602_v37 }
  0x19   :  { %67 = vadd.xlane.f32.xlu1 %v66_v16  ;;  %v410_v53 = vrot.slane %v86_v45, %v353_v39  ;;  %v431_v54 = vrot.slane %v86_v45, %v1608_v41  ;;  %v424_v56 = vrot.slane %v86_v45, %v1611_v43  ;;  %v445_v57 = vrot.slane %v87_v55, %v1580_v26 }
  0x1a   :  { %64 = vadd.xlane.f32.xlu0 %v63_v17  ;;  %v438_v58 = vrot.slane %v86_v45, %v1619_v47  ;;  %v459_v59 = vrot.slane %v87_v55, %v1594_v33  ;;  %v452_v60 = vrot.slane %v87_v55, %v1587_v30  ;;  %v473_v61 = vrot.slane %v87_v55, %v1602_v37 }
  0x1b   :  { %v466_v62 = vrot.slane %v87_v55, %v353_v39  ;;  %v487_v63 = vrot.slane %v87_v55, %v1608_v41  ;;  %v480_v1 = vrot.slane %v87_v55, %v1611_v43  ;;  %v501_v2 = vrot.slane %v1640_v0, %v1580_v26 }
  0x1c   :  { %v494_v3 = vrot.slane %v87_v55, %v1619_v47  ;;  %v515_v4 = vrot.slane %v1640_v0, %v1594_v33  ;;  %v508_v5 = vrot.slane %v1640_v0, %v1587_v30  ;;  %v522_v6 = vrot.slane %v1640_v0, %v353_v39 }
  0x1d   :  { %73 = vadd.xlane.f32.xlu1 %v72_v22  ;;  %v529_v55 = vrot.slane %v1640_v0, %v1602_v37  ;;  %vm1171_vm9 = vcmask 1046534   ;;  %vm1173_vm10 = vcmask 1047559   ;;  %vm1232_vm11 = vcmask 15360  }
  0x1e   :  { %70 = vadd.xlane.f32.xlu0 %v69_v23 }
  0x2e   :  { %100 = vbcast.lane.b32.xlu1 %v94_v28, 264 }
  0x32   :  { %104 = vbcast.lane.b32.xlu1 %v94_v28, 272 }
  0x34   :  { %96 = vbcast.lane.b32.xlu0 %v94_v28, 256 }
  0x36   :  { %108 = vbcast.lane.b32.xlu1 %v94_v28, 280 }
  0x38   :  { %115 = vbcast.lane.b32.xlu0 %v113_v31, 256 }
  0x3a   :  { %119 = vbcast.lane.b32.xlu1 %v113_v31, 264 }
  0x3c   :  { %123 = vbcast.lane.b32.xlu0 %v113_v31, 272 }
  0x3e   :  { %127 = vbcast.lane.b32.xlu1 %v113_v31, 280 }
  0x40   :  { %319 = vbcast.lane.b32.xlu0 %v1426_v34, 256 }
  0x42   :  { %335 = vbcast.lane.b32.xlu1 %v333_v35, 256 }
  0x44   :  { %349 = vbcast.lane.b32.xlu0 %v347_v36, 256 }
  0x46   :  { %342 = vbcast.lane.b32.xlu1 %v340_v38, 256 }
  0x48   :  { %363 = vbcast.lane.b32.xlu0 %v361_v40, 256 }
  0x4a   :  { %356 = vbcast.lane.b32.xlu1 %v354_v42, 256 }
  0x4c   :  { %377 = vbcast.lane.b32.xlu0 %v375_v44, 256 }
  0x4e   :  { %370 = vbcast.lane.b32.xlu1 %v368_v46, 256 }
  0x50   :  { %391 = vbcast.lane.b32.xlu0 %v389_v48, 256 }
  0x52   :  { %384 = vbcast.lane.b32.xlu1 %v382_v49, 256 }
  0x54   :  { %405 = vbcast.lane.b32.xlu0 %v403_v50, 256 }
  0x56   :  { %398 = vbcast.lane.b32.xlu1 %v396_v51, 256 }
  0x58   :  { %419 = vbcast.lane.b32.xlu0 %v417_v52, 256  ;;  %v536_v52 = vrot.slane %v1640_v0, %v1611_v43 }
  0x5a   :  { %412 = vbcast.lane.b32.xlu1 %v410_v53, 256 }
  0x5c   :  { %433 = vbcast.lane.b32.xlu0 %v431_v54, 256  ;;  %v550_v54 = vrot.slane %v1640_v0, %v1619_v47 }
  0x5e   :  { %426 = vbcast.lane.b32.xlu1 %v424_v56, 256 }
  0x60   :  { %447 = vbcast.lane.b32.xlu0 %v445_v57, 256  ;;  %v543_v57 = vrot.slane %v1640_v0, %v1608_v41 }
  0x62   :  { %440 = vbcast.lane.b32.xlu1 %v438_v58, 256 }
  0x64   :  { %461 = vbcast.lane.b32.xlu0 %v459_v59, 256 }
  0x66   :  { %454 = vbcast.lane.b32.xlu1 %v452_v60, 256 }
  0x68   :  { %475 = vbcast.lane.b32.xlu0 %v473_v61, 256 }
  0x6a   :  { %468 = vbcast.lane.b32.xlu1 %v466_v62, 256 }
  0x6c   :  { %489 = vbcast.lane.b32.xlu0 %v487_v63, 256 }
  0x6e   :  { %482 = vbcast.lane.b32.xlu1 %v480_v1, 256 }
  0x70   :  { %503 = vbcast.lane.b32.xlu0 %v501_v2, 256 }
  0x72   :  { %496 = vbcast.lane.b32.xlu1 %v494_v3, 256 }
  0x74   :  { %517 = vbcast.lane.b32.xlu0 %v515_v4, 256 }
  0x76   :  { %510 = vbcast.lane.b32.xlu1 %v508_v5, 256 }
  0x7a   :  { %524 = vbcast.lane.b32.xlu1 %v522_v6, 256 }
  0x9a   :  { %v59_v7 = vpop.xlane.xlu1 %58 }
  0x9b   :  { %v53_v8 = vpop.xlane.xlu0 %52  ;;  %v77_v21 = vmul.f32 0.00390625, %v59_v7 }
  0x9c   :  { %v75_v16 = vmul.f32 0.00390625, %v53_v8 }
  0x9e   :  { %v62_v9 = vpop.xlane.xlu1 %61 }
  0x9f   :  { %v56_v10 = vpop.xlane.xlu0 %55  ;;  %v78_v27 = vmul.f32 0.00390625, %v62_v9 }
  0xa0   :  { %v76_v15 = vmul.f32 0.00390625, %v56_v10 }
  0xa2   :  { %v68_v11 = vpop.xlane.xlu1 %67 }
  0xa3   :  { %v65_v12 = vpop.xlane.xlu0 %64  ;;  %v80_v40 = vmul.f32 0.00390625, %v68_v11 }
  0xa4   :  { %v79_v35 = vmul.f32 0.00390625, %v65_v12 }
  0xa6   :  { %v74_v13 = vpop.xlane.xlu1 %73 }
  0xa7   :  { %v71_v14 = vpop.xlane.xlu0 %70  ;;  %v82_v46 = vmul.f32 0.00390625, %v74_v13 }
  0xa8   :  { %v81_v42 = vmul.f32 0.00390625, %v71_v14 }
  0xaa   :  { %v101_v17 = vpop.permute.xlu1 %100 }
  0xab   :  { %v138_v18 = vmul.f32 %v101_v17, %v76_v15  ;;  %v97_v19 = vpop.permute.xlu0 %96  ;;  %v146_v44 = vmul.f32 %v101_v17, %v80_v40 }
  0xac   :  { %v137_v20 = vmul.f32 %v97_v19, %v75_v16  ;;  %v145_v38 = vmul.f32 %v97_v19, %v79_v35  ;;  %v218_v19 = vand.u32 127, %v91_v24 }
  0xad   :  { %173 = vperm.xlu1 %1442, %v138_v18  }
  0xae   :  { %170 = vperm.xlu0 %1441, %v137_v20   ;;  %v105_v22 = vpop.permute.xlu1 %104 }
  0xaf   :  { %v139_v23 = vmul.f32 %v105_v22, %v77_v21  ;;  %v116_v26 = vpop.permute.xlu0 %115  ;;  %v147_v45 = vmul.f32 %v105_v22, %v81_v42  ;;  %v223_v22 = vadd.s32 4294967288, %v218_v19 }
  0xb0   :  { %v141_v29 = vmul.f32 %v116_v26, %v75_v16  ;;  %v149_v48 = vmul.f32 %v116_v26, %v79_v35  ;;  %v237_v26 = vadd.s32 4294967272, %v218_v19 }
  0xb1   :  { %176 = vperm.xlu1 %1442, %v139_v23   ;;  %v230_v23 = vadd.s32 4294967280, %v218_v19 }
  0xb2   :  { %v109_v28 = vpop.permute.xlu1 %108 }
  0xb3   :  { %v140_v30 = vmul.f32 %v109_v28, %v78_v27  ;;  %v124_v31 = vpop.permute.xlu0 %123  ;;  %v148_v49 = vmul.f32 %v109_v28, %v82_v46 }
  0xb4   :  { %v143_v33 = vmul.f32 %v124_v31, %v77_v21  ;;  %v151_v50 = vmul.f32 %v124_v31, %v81_v42  ;;  %v233_v31 = vsub.s32 %v230_v23, %v1577_v25 }
  0xb5   :  { %179 = vperm.xlu0 %1441, %v140_v30   ;;  %182 = vperm.xlu1 %1442, %v141_v29   ;;  %v1719_v29 = vsub.s32 %v218_v19, %v1577_v25  ;;  %v226_v30 = vsub.s32 %v223_v22, %v1577_v25 }
  0xb6   :  { %v120_v32 = vpop.permute.xlu1 %119 }
  0xb7   :  { %v142_v34 = vmul.f32 %v120_v32, %v76_v15  ;;  %v150_v51 = vmul.f32 %v120_v32, %v80_v40  ;;  %v1663_v43 = vpop.permute.xlu0 %319  ;;  %v240_v32 = vsub.s32 %v237_v26, %v1577_v25 }
  0xb9   :  { %185 = vperm.xlu0 %1441, %v142_v34   ;;  %188 = vperm.xlu1 %1442, %v143_v33  }
  0xba   :  { %v128_v36 = vpop.permute.xlu1 %127 }
  0xbb   :  { %v144_v39 = vmul.f32 %v128_v36, %v78_v27  ;;  %v152_v53 = vmul.f32 %v128_v36, %v82_v46  ;;  %v1667_v60 = vpop.permute.xlu0 %349 }
  0xbd   :  { %191 = vperm.xlu0 %1441, %v144_v39   ;;  %194 = vperm.xlu1 %1442, %v145_v38  }
  0xbe   :  { %v1657_v56 = vpop.permute.xlu1 %335 }
  0xbf   :  { %v1671_v61 = vpop.permute.xlu0 %363 }
  0xc1   :  { %197 = vperm.xlu0 %1441, %v146_v44   ;;  %200 = vperm.xlu1 %1442, %v147_v45  }
  0xc2   :  { %v1661_v58 = vpop.permute.xlu1 %342 }
  0xc3   :  { %v1675_v62 = vpop.permute.xlu0 %377 }
  0xc5   :  { %203 = vperm.xlu0 %1441, %v148_v49   ;;  %206 = vperm.xlu1 %1442, %v149_v48  }
  0xc6   :  { %v1665_v59 = vpop.permute.xlu1 %356 }
  0xc7   :  { %v1679_v41 = vpop.permute.xlu0 %391 }
  0xc9   :  { %209 = vperm.xlu0 %1441, %v150_v51   ;;  %212 = vperm.xlu1 %1442, %v151_v50  }
  0xca   :  { %v1669_v47 = vpop.permute.xlu1 %370 }
  0xcb   :  { %v1683_v1 = vpop.permute.xlu0 %405 }
  0xcd   :  { %215 = vperm.xlu0 %1441, %v152_v53   ;;  %538 = vbcast.lane.b32.xlu1 %v536_v52, 256 }
  0xce   :  { %v1673_v37 = vpop.permute.xlu1 %384 }
  0xcf   :  { %v1687_v3 = vpop.permute.xlu0 %419 }
  0xd1   :  { %552 = vbcast.lane.b32.xlu1 %v550_v54, 256  ;;  %531 = vbcast.lane.b32.xlu0 %v529_v55, 256 }
  0xd2   :  { %v1677_v63 = vpop.permute.xlu1 %398 }
  0xd3   :  { %v1691_v5 = vpop.permute.xlu0 %433 }
  0xd5   :  { %545 = vbcast.lane.b32.xlu0 %v543_v57, 256 }
  0xd6   :  { %v1681_v0 = vpop.permute.xlu1 %412 }
  0xd7   :  { %v1695_v7 = vpop.permute.xlu0 %447 }
  0xda   :  { %v1685_v2 = vpop.permute.xlu1 %426 }
  0xdb   :  { %v1699_v9 = vpop.permute.xlu0 %461 }
  0xde   :  { %v1689_v4 = vpop.permute.xlu1 %440 }
  0xdf   :  { %v1703_v11 = vpop.permute.xlu0 %475 }
  0xe2   :  { %v1693_v6 = vpop.permute.xlu1 %454 }
  0xe3   :  { %v1707_v13 = vpop.permute.xlu0 %489 }
  0xe6   :  { %v1697_v8 = vpop.permute.xlu1 %468 }
  0xe7   :  { %v1711_v15 = vpop.permute.xlu0 %503 }
  0xea   :  { %v1701_v10 = vpop.permute.xlu1 %482 }
  0xeb   :  { %v1715_v17 = vpop.permute.xlu0 %517 }
  0xee   :  { %v1705_v12 = vpop.permute.xlu1 %496 }
  0xf2   :  { %v1709_v14 = vpop.permute.xlu1 %510 }
  0xf6   :  { %v1713_v16 = vpop.permute.xlu1 %524 }
 0x128   :  { %v174_v18 = vpop.permute.xlu1 %173 }
 0x129   :  { %v171_v20 = vpop.permute.xlu0 %170  ;;  %v227_v35 = vrot.slane %v174_v18, %v226_v30 }
 0x12a   :  { %v222_v24 = vrot.slane %v171_v20, %v1719_v29 }
 0x12c   :  { %v177_v21 = vpop.permute.xlu1 %176  ;;  %v229_v25 = vsel %vm228_vm0, %v227_v35, %v222_v24 }
 0x12d   :  { %v234_v39 = vrot.slane %v177_v21, %v233_v31 }
 0x12f   :  { %v236_v49 = vsel %vm235_vm1, %v234_v39, %v229_v25 }
 0x130   :  { %v183_v27 = vpop.permute.xlu1 %182  ;;  %v180_v28 = vpop.permute.xlu0 %179 }
 0x131   :  { %v247_v36 = vrot.slane %v183_v27, %v1719_v29  ;;  %v241_v42 = vrot.slane %v180_v28, %v240_v32 }
 0x133   :  { %v243_v51 = vsel %vm242_vm2, %v241_v42, %v236_v49 }
 0x134   :  { %v189_v33 = vpop.permute.xlu1 %188  ;;  %v186_v34 = vpop.permute.xlu0 %185 }
 0x135   :  { %v251_v38 = vrot.slane %v186_v34, %v226_v30  ;;  %v256_v40 = vrot.slane %v189_v33, %v233_v31 }
 0x137   :  { %v252_v44 = vsel %vm228_vm0, %v251_v38, %v247_v36 }
 0x138   :  { %v195_v45 = vpop.permute.xlu1 %194  ;;  %v192_v46 = vpop.permute.xlu0 %191  ;;  %v257_v50 = vsel %vm235_vm1, %v256_v40, %v252_v44 }
 0x139   :  { %v261_v48 = vrot.slane %v192_v46, %v240_v32  ;;  %v266_v23 = vrot.slane %v195_v45, %v1719_v29 }
 0x13b   :  { %v262_v52 = vsel %vm242_vm2, %v261_v48, %v257_v50 }
 0x13c   :  { %v201_v53 = vpop.permute.xlu1 %200  ;;  %v198_v54 = vpop.permute.xlu0 %197  ;;  %v302_v55 = vsel %vm301_vm3, %v262_v52, %v243_v51 }
 0x13d   :  { %v307_v57 = vsel %vm306_vm4, %v302_v55, 0.0  ;;  %v270_v20 = vrot.slane %v198_v54, %v226_v30  ;;  %v275_v28 = vrot.slane %v201_v53, %v233_v31 }
 0x13e   :  { %308 = vadd.xlane.f32.xlu1 %v307_v57 }
 0x13f   :  { %v271_v34 = vsel %vm228_vm0, %v270_v20, %v266_v23 }
 0x140   :  { %v207_v18 = vpop.permute.xlu1 %206  ;;  %v204_v19 = vpop.permute.xlu0 %203  ;;  %v276_v39 = vsel %vm235_vm1, %v275_v28, %v271_v34 }
 0x141   :  { %v285_v26 = vrot.slane %v207_v18, %v1719_v29  ;;  %v280_v35 = vrot.slane %v204_v19, %v240_v32 }
 0x143   :  { %v281_v42 = vsel %vm242_vm2, %v280_v35, %v276_v39 }
 0x144   :  { %v213_v21 = vpop.permute.xlu1 %212  ;;  %v210_v22 = vpop.permute.xlu0 %209 }
 0x145   :  { %v289_v27 = vrot.slane %v210_v22, %v226_v30  ;;  %v294_v33 = vrot.slane %v213_v21, %v233_v31 }
 0x147   :  { %v290_v24 = vsel %vm228_vm0, %v289_v27, %v285_v26 }
 0x148   :  { %v216_v36 = vpop.permute.xlu0 %215  ;;  %v295_v40 = vsel %vm235_vm1, %v294_v33, %v290_v24  ;;  %v1744_v31 = vpop.permute.xlu1 %538 }
 0x149   :  { %v299_v38 = vrot.slane %v216_v36, %v240_v32 }
 0x14b   :  { %v300_v44 = vsel %vm242_vm2, %v299_v38, %v295_v40 }
 0x14c   :  { %v303_v45 = vsel %vm301_vm3, %v300_v44, %v281_v42  ;;  %v553_v46 = vpop.permute.xlu1 %552  ;;  %v1749_v49 = vpop.permute.xlu0 %531 }
 0x14d   :  { %v310_v30 = vsel %vm306_vm4, %v303_v45, 0.0 }
 0x14e   :  { %311 = vadd.xlane.f32.xlu0 %v310_v30 }
 0x150   :  { %v546_v54 = vpop.permute.xlu0 %545 }
 0x1c7   :  { %v309_v25 = vpop.xlane.xlu1 %308 }
 0x1c8   :  { %v322_v48 = vadd.f32 %v1663_v43, %v309_v25 }
 0x1ca   :  { %v1747_v32 = vmax.f32 %v322_v48, 0.0 }
 0x1cc   :  { %v586_v50 = vmul.f32 %v1657_v56, %v1747_v32  ;;  %v587_v51 = vmul.f32 %v1661_v58, %v1747_v32  ;;  %v589_v52 = vmul.f32 %v1665_v59, %v1747_v32  ;;  %v588_v53 = vmul.f32 %v1667_v60, %v1747_v32 }
 0x1cd   :  { %v1760_v55 = vmul.f32 %v546_v54, %v1747_v32  ;;  %v1763_v57 = vmul.f32 %v553_v46, %v1747_v32  ;;  %v591_v18 = vmul.f32 %v1669_v47, %v1747_v32  ;;  %v590_v19 = vmul.f32 %v1671_v61, %v1747_v32 }
 0x1ce   :  { %718 = vperm.xlu1 %1442, %v587_v51   ;;  %715 = vperm.xlu0 %1441, %v586_v50   ;;  %v593_v20 = vmul.f32 %v1673_v37, %v1747_v32  ;;  %v592_v22 = vmul.f32 %v1675_v62, %v1747_v32  ;;  %v595_v26 = vmul.f32 %v1677_v63, %v1747_v32 }
 0x1cf   :  { %v594_v27 = vmul.f32 %v1679_v41, %v1747_v32  ;;  %v597_v33 = vmul.f32 %v1681_v0, %v1747_v32  ;;  %v596_v34 = vmul.f32 %v1683_v1, %v1747_v32  ;;  %v599_v24 = vmul.f32 %v1685_v2, %v1747_v32 }
 0x1d0   :  { %v598_v36 = vmul.f32 %v1687_v3, %v1747_v32  ;;  %v601_v38 = vmul.f32 %v1689_v4, %v1747_v32  ;;  %v600_v39 = vmul.f32 %v1691_v5, %v1747_v32  ;;  %v603_v40 = vmul.f32 %v1693_v6, %v1747_v32 }
 0x1d1   :  { %v602_v42 = vmul.f32 %v1695_v7, %v1747_v32  ;;  %v605_v44 = vmul.f32 %v1697_v8, %v1747_v32  ;;  %v604_v45 = vmul.f32 %v1699_v9, %v1747_v32  ;;  %v607_v30 = vmul.f32 %v1701_v10, %v1747_v32 }
 0x1d2   :  { %724 = vperm.xlu1 %1442, %v589_v52   ;;  %721 = vperm.xlu0 %1441, %v588_v53   ;;  %v610_v25 = vmul.f32 %v1711_v15, %v1747_v32  ;;  %v608_v48 = vmul.f32 %v1707_v13, %v1747_v32  ;;  %v611_v51 = vmul.f32 %v1709_v14, %v1747_v32 }
 0x1d6   :  { %730 = vperm.xlu1 %1442, %v591_v18   ;;  %727 = vperm.xlu0 %1441, %v590_v19  }
 0x1d7   :  { %v312_v21 = vpop.xlane.xlu0 %311 }
 0x1d8   :  { %v323_v23 = vadd.f32 %v1663_v43, %v312_v21 }
 0x1da   :  { %736 = vperm.xlu1 %1442, %v593_v20   ;;  %733 = vperm.xlu0 %1441, %v592_v22   ;;  %v1778_v28 = vmax.f32 %v323_v23, 0.0  ;;  %v613_v20 = vmul.f32 %v1713_v16, %v1747_v32  ;;  %v615_v22 = vmul.f32 %v1744_v31, %v1747_v32 }
 0x1dc   :  { %v1785_v43 = vmul.f32 %v546_v54, %v1778_v28  ;;  %v1788_v35 = vmul.f32 %v553_v46, %v1778_v28  ;;  %v606_v46 = vmul.f32 %v1703_v11, %v1747_v32  ;;  %v618_v50 = vmul.f32 %v1657_v56, %v1778_v28 }
 0x1dd   :  { %v626_v52 = vmul.f32 %v1679_v41, %v1778_v28  ;;  %v619_v53 = vmul.f32 %v1661_v58, %v1778_v28  ;;  %v634_v54 = vmul.f32 %v1695_v7, %v1778_v28  ;;  %v627_v18 = vmul.f32 %v1677_v63, %v1778_v28 }
 0x1de   :  { %742 = vperm.xlu1 %1442, %v595_v26   ;;  %739 = vperm.xlu0 %1441, %v594_v27   ;;  %v642_v56 = vmul.f32 %v1711_v15, %v1778_v28  ;;  %v635_v19 = vmul.f32 %v1693_v6, %v1778_v28  ;;  %v612_v58 = vmul.f32 %v1715_v17, %v1747_v32 }
 0x1df   :  { %v643_v41 = vmul.f32 %v1709_v14, %v1778_v28  ;;  %v628_v63 = vmul.f32 %v1683_v1, %v1778_v28  ;;  %v620_v7 = vmul.f32 %v1667_v60, %v1778_v28  ;;  %v644_v6 = vmul.f32 %v1715_v17, %v1778_v28 }
 0x1e0   :  { %v636_v15 = vmul.f32 %v1699_v9, %v1778_v28  ;;  %v621_v14 = vmul.f32 %v1665_v59, %v1778_v28  ;;  %v637_v60 = vmul.f32 %v1697_v8, %v1778_v28  ;;  %v629_v1 = vmul.f32 %v1681_v0, %v1778_v28 }
 0x1e1   :  { %v614_v9 = vmul.f32 %v1749_v49, %v1747_v32  ;;  %v645_v17 = vmul.f32 %v1713_v16, %v1778_v28  ;;  %v630_v59 = vmul.f32 %v1687_v3, %v1778_v28  ;;  %v622_v21 = vmul.f32 %v1671_v61, %v1778_v28 }
 0x1e2   :  { %748 = vperm.xlu1 %1442, %v597_v33   ;;  %745 = vperm.xlu0 %1441, %v596_v34   ;;  %v646_v0 = vmul.f32 %v1749_v49, %v1778_v28  ;;  %v638_v8 = vmul.f32 %v1703_v11, %v1778_v28  ;;  %v623_v16 = vmul.f32 %v1669_v47, %v1778_v28 }
 0x1e3   :  { %v639_v61 = vmul.f32 %v1701_v10, %v1778_v28  ;;  %v631_v3 = vmul.f32 %v1685_v2, %v1778_v28  ;;  %v647_v11 = vmul.f32 %v1744_v31, %v1778_v28  ;;  %v632_v47 = vmul.f32 %v1691_v5, %v1778_v28 }
 0x1e4   :  { %v624_v49 = vmul.f32 %v1675_v62, %v1778_v28  ;;  %v640_v10 = vmul.f32 %v1707_v13, %v1778_v28  ;;  %v609_v2 = vmul.f32 %v1705_v12, %v1747_v32  ;;  %v633_v5 = vmul.f32 %v1689_v4, %v1778_v28 }
 0x1e5   :  { %v625_v62 = vmul.f32 %v1673_v37, %v1778_v28  ;;  %v641_v13 = vmul.f32 %v1705_v12, %v1778_v28 }
 0x1e6   :  { %754 = vperm.xlu1 %1442, %v599_v24   ;;  %751 = vperm.xlu0 %1441, %v598_v36  }
 0x1ea   :  { %760 = vperm.xlu1 %1442, %v601_v38   ;;  %757 = vperm.xlu0 %1441, %v600_v39  }
 0x1ee   :  { %766 = vperm.xlu1 %1442, %v603_v40   ;;  %763 = vperm.xlu0 %1441, %v602_v42  }
 0x1f2   :  { %772 = vperm.xlu1 %1442, %v605_v44   ;;  %769 = vperm.xlu0 %1441, %v604_v45  }
 0x1f6   :  { %778 = vperm.xlu1 %1442, %v607_v30   ;;  %775 = vperm.xlu0 %1441, %v606_v46  }
 0x1fa   :  { %787 = vperm.xlu1 %1442, %v610_v25   ;;  %781 = vperm.xlu0 %1441, %v608_v48  }
 0x1fe   :  { %811 = vperm.xlu1 %1442, %v618_v50   ;;  %790 = vperm.xlu0 %1441, %v611_v51  }
 0x202   :  { %835 = vperm.xlu1 %1442, %v626_v52   ;;  %814 = vperm.xlu0 %1441, %v619_v53  }
 0x206   :  { %859 = vperm.xlu1 %1442, %v634_v54   ;;  %838 = vperm.xlu0 %1441, %v627_v18  }
 0x20a   :  { %883 = vperm.xlu1 %1442, %v642_v56   ;;  %862 = vperm.xlu0 %1441, %v635_v19  }
 0x20e   :  { %793 = vperm.xlu1 %1442, %v612_v58   ;;  %886 = vperm.xlu0 %1441, %v643_v41  }
 0x212   :  { %841 = vperm.xlu1 %1442, %v628_v63   ;;  %817 = vperm.xlu0 %1441, %v620_v7  }
 0x216   :  { %889 = vperm.xlu1 %1442, %v644_v6   ;;  %865 = vperm.xlu0 %1441, %v636_v15  }
 0x21a   :  { %820 = vperm.xlu1 %1442, %v621_v14   ;;  %796 = vperm.xlu0 %1441, %v613_v20  }
 0x21e   :  { %868 = vperm.xlu1 %1442, %v637_v60   ;;  %844 = vperm.xlu0 %1441, %v629_v1  }
 0x222   :  { %799 = vperm.xlu1 %1442, %v614_v9   ;;  %892 = vperm.xlu0 %1441, %v645_v17  }
 0x226   :  { %847 = vperm.xlu1 %1442, %v630_v59   ;;  %823 = vperm.xlu0 %1441, %v622_v21  }
 0x22a   :  { %895 = vperm.xlu1 %1442, %v646_v0   ;;  %871 = vperm.xlu0 %1441, %v638_v8  }
 0x22e   :  { %826 = vperm.xlu1 %1442, %v623_v16   ;;  %802 = vperm.xlu0 %1441, %v615_v22  }
 0x232   :  { %874 = vperm.xlu1 %1442, %v639_v61   ;;  %850 = vperm.xlu0 %1441, %v631_v3  }
 0x236   :  { %805 = vperm.xlu1 %1442, %v1760_v55   ;;  %898 = vperm.xlu0 %1441, %v647_v11  }
 0x23a   :  { %853 = vperm.xlu1 %1442, %v632_v47   ;;  %829 = vperm.xlu0 %1441, %v624_v49  }
 0x23e   :  { %901 = vperm.xlu1 %1442, %v1785_v43   ;;  %877 = vperm.xlu0 %1441, %v640_v10  }
 0x242   :  { %808 = vperm.xlu1 %1442, %v1763_v57   ;;  %784 = vperm.xlu0 %1441, %v609_v2  }
 0x246   :  { %856 = vperm.xlu1 %1442, %v633_v5   ;;  %832 = vperm.xlu0 %1441, %v625_v62  }
 0x249   :  { %v719_v31 = vpop.permute.xlu1 %718  ;;  %v716_v55 = vpop.permute.xlu0 %715 }
 0x24a   :  { %904 = vperm.xlu1 %1442, %v1788_v35   ;;  %880 = vperm.xlu0 %1441, %v641_v13   ;;  %v913_v4 = vrot.slane %v719_v31, %v1719_v29  ;;  %v909_v33 = vrot.slane %v716_v55, %v1719_v29 }
 0x24c   :  { %v1162_v12 = vsel %vm301_vm3, %v913_v4, %v909_v33 }
 0x24d   :  { %v725_v32 = vpop.permute.xlu1 %724  ;;  %v722_v23 = vpop.permute.xlu0 %721 }
 0x24e   :  { %v917_v34 = vrot.slane %v722_v23, %v1719_v29  ;;  %v921_v28 = vrot.slane %v725_v32, %v1719_v29 }
 0x250   :  { %v1164_v24 = vsel %vm1163_vm5, %v917_v34, %v1162_v12 }
 0x251   :  { %v731_v57 = vpop.permute.xlu1 %730  ;;  %v728_v26 = vpop.permute.xlu0 %727  ;;  %v1166_v44 = vsel %vm1165_vm6, %v921_v28, %v1164_v24 }
 0x252   :  { %v925_v36 = vrot.slane %v728_v26, %v1719_v29  ;;  %v929_v42 = vrot.slane %v731_v57, %v1719_v29 }
 0x254   :  { %v1168_v30 = vsel %vm1167_vm7, %v925_v36, %v1166_v44 }
 0x255   :  { %v737_v27 = vpop.permute.xlu1 %736  ;;  %v734_v37 = vpop.permute.xlu0 %733  ;;  %v1170_v18 = vsel %vm1169_vm8, %v929_v42, %v1168_v30 }
 0x256   :  { %v933_v46 = vrot.slane %v734_v37, %v1719_v29  ;;  %v937_v53 = vrot.slane %v737_v27, %v1719_v29 }
 0x258   :  { %v1172_v19 = vsel %vm1171_vm9, %v933_v46, %v1170_v18 }
 0x259   :  { %v743_v43 = vpop.permute.xlu1 %742  ;;  %v740_v35 = vpop.permute.xlu0 %739  ;;  %v1174_v14 = vsel %vm1173_vm10, %v937_v53, %v1172_v19 }
 0x25a   :  { %v945_v38 = vrot.slane %v743_v43, %v1719_v29  ;;  %v941_v39 = vrot.slane %v740_v35, %v1719_v29  ;;  %v1233_v9 = vsel %vm1232_vm11, %v1174_v14, 0.0 }
 0x25c   :  { %v1175_v48 = vsel %vm301_vm3, %v945_v38, %v941_v39 }
 0x25d   :  { %v749_v40 = vpop.permute.xlu1 %748  ;;  %v746_v45 = vpop.permute.xlu0 %745 }
 0x25e   :  { %v949_v25 = vrot.slane %v746_v45, %v1719_v29  ;;  %v953_v50 = vrot.slane %v749_v40, %v1719_v29 }
 0x260   :  { %v1176_v51 = vsel %vm1163_vm5, %v949_v25, %v1175_v48 }
 0x261   :  { %v755_v52 = vpop.permute.xlu1 %754  ;;  %v752_v54 = vpop.permute.xlu0 %751  ;;  %v1177_v41 = vsel %vm1165_vm6, %v953_v50, %v1176_v51 }
 0x262   :  { %v957_v56 = vrot.slane %v752_v54, %v1719_v29  ;;  %v961_v58 = vrot.slane %v755_v52, %v1719_v29 }
 0x264   :  { %v1178_v63 = vsel %vm1167_vm7, %v957_v56, %v1177_v41 }
 0x265   :  { %v761_v7 = vpop.permute.xlu1 %760  ;;  %v758_v15 = vpop.permute.xlu0 %757  ;;  %v1179_v60 = vsel %vm1169_vm8, %v961_v58, %v1178_v63 }
 0x266   :  { %v969_v6 = vrot.slane %v761_v7, %v1719_v29  ;;  %v965_v20 = vrot.slane %v758_v15, %v1719_v29 }
 0x268   :  { %v1180_v17 = vsel %vm1171_vm9, %v965_v20, %v1179_v60 }
 0x269   :  { %v767_v1 = vpop.permute.xlu1 %766  ;;  %1234 = vadd.xlane.f32.xlu0 %v1233_v9  ;;  %v764_v21 = vpop.permute.xlu0 %763  ;;  %v1181_v0 = vsel %vm1173_vm10, %v969_v6, %v1180_v17 }
 0x26a   :  { %v977_v59 = vrot.slane %v767_v1, %v1719_v29  ;;  %v973_v8 = vrot.slane %v764_v21, %v1719_v29  ;;  %v1236_v61 = vsel %vm1232_vm11, %v1181_v0, 0.0 }
 0x26c   :  { %v1182_v16 = vsel %vm301_vm3, %v977_v59, %v973_v8 }
 0x26d   :  { %v773_v22 = vpop.permute.xlu1 %772  ;;  %v770_v11 = vpop.permute.xlu0 %769 }
 0x26e   :  { %v985_v3 = vrot.slane %v773_v22, %v1719_v29  ;;  %1237 = vadd.xlane.f32.xlu1 %v1236_v61  ;;  %v981_v47 = vrot.slane %v770_v11, %v1719_v29 }
 0x270   :  { %v1183_v49 = vsel %vm1163_vm5, %v981_v47, %v1182_v16 }
 0x271   :  { %v779_v10 = vpop.permute.xlu1 %778  ;;  %v1184_v5 = vsel %vm1165_vm6, %v985_v3, %v1183_v49  ;;  %v776_v62 = vpop.permute.xlu0 %775 }
 0x272   :  { %v993_v2 = vrot.slane %v779_v10, %v1719_v29  ;;  %v989_v13 = vrot.slane %v776_v62, %v1719_v29 }
 0x274   :  { %v1185_v31 = vsel %vm1167_vm7, %v989_v13, %v1184_v5 }
 0x275   :  { %v788_v55 = vpop.permute.xlu1 %787  ;;  %v782_v32 = vpop.permute.xlu0 %781  ;;  %v1186_v23 = vsel %vm1169_vm8, %v993_v2, %v1185_v31 }
 0x276   :  { %v997_v57 = vrot.slane %v782_v32, %v1719_v29  ;;  %v1005_v33 = vrot.slane %v788_v55, %v1719_v29 }
 0x278   :  { %v1935_v27 = vsel %vm1171_vm9, %v997_v57, %v1186_v23 }
 0x279   :  { %v812_v26 = vpop.permute.xlu1 %811  ;;  %v791_v4 = vpop.permute.xlu0 %790 }
 0x27a   :  { %v1009_v37 = vrot.slane %v791_v4, %v1719_v29  ;;  %v1037_v28 = vrot.slane %v812_v26, %v1719_v29 }
 0x27c   :  { %v1940_v34 = vsel %vm301_vm3, %v1009_v37, %v1005_v33 }
 0x27d   :  { %v836_v43 = vpop.permute.xlu1 %835  ;;  %v815_v12 = vpop.permute.xlu0 %814 }
 0x27e   :  { %v1041_v35 = vrot.slane %v815_v12, %v1719_v29  ;;  %v1069_v47 = vrot.slane %v836_v43, %v1719_v29 }
 0x280   :  { %v1945_v24 = vsel %vm301_vm3, %v1041_v35, %v1037_v28 }
 0x281   :  { %v1947_v36 = vpop.permute.xlu1 %859  ;;  %v839_v38 = vpop.permute.xlu0 %838 }
 0x282   :  { %v1073_v11 = vrot.slane %v839_v38, %v1719_v29  ;;  %v1101_v55 = vrot.slane %v1947_v36, %v1719_v29 }
 0x284   :  { %v1203_v32 = vsel %vm301_vm3, %v1073_v11, %v1069_v47 }
 0x285   :  { %v884_v39 = vpop.permute.xlu1 %883  ;;  %v1949_v40 = vpop.permute.xlu0 %862 }
 0x286   :  { %v1133_v45 = vrot.slane %v884_v39, %v1719_v29  ;;  %v1105_v23 = vrot.slane %v1949_v40, %v1719_v29 }
 0x289   :  { %v794_v42 = vpop.permute.xlu1 %793  ;;  %v887_v44 = vpop.permute.xlu0 %886 }
 0x28a   :  { %v1137_v30 = vrot.slane %v887_v44, %v1719_v29  ;;  %v1013_v49 = vrot.slane %v794_v42, %v1719_v29 }
 0x28c   :  { %v1217_v46 = vsel %vm301_vm3, %v1137_v30, %v1133_v45  ;;  %v1190_v43 = vsel %vm1163_vm5, %v1013_v49, %v1940_v34 }
 0x28d   :  { %v842_v25 = vpop.permute.xlu1 %841  ;;  %v818_v48 = vpop.permute.xlu0 %817 }
 0x28e   :  { %v1077_v10 = vrot.slane %v842_v25, %v1719_v29  ;;  %v1045_v5 = vrot.slane %v818_v48, %v1719_v29 }
 0x290   :  { %v1204_v12 = vsel %vm1163_vm5, %v1077_v10, %v1203_v32  ;;  %v1197_v38 = vsel %vm1163_vm5, %v1045_v5, %v1945_v24 }
 0x291   :  { %v890_v50 = vpop.permute.xlu1 %889  ;;  %v1955_v52 = vpop.permute.xlu0 %865 }
 0x292   :  { %v1141_v51 = vrot.slane %v890_v50, %v1719_v29  ;;  %v1109_v39 = vrot.slane %v1955_v52, %v1719_v29 }
 0x294   :  { %v1218_v53 = vsel %vm1163_vm5, %v1141_v51, %v1217_v46 }
 0x295   :  { %v821_v54 = vpop.permute.xlu1 %820  ;;  %v797_v18 = vpop.permute.xlu0 %796 }
 0x296   :  { %v1017_v62 = vrot.slane %v797_v18, %v1719_v29  ;;  %v1049_v26 = vrot.slane %v821_v54, %v1719_v29 }
 0x298   :  { %v1191_v40 = vsel %vm1165_vm6, %v1017_v62, %v1190_v43  ;;  %v1198_v25 = vsel %vm1165_vm6, %v1049_v26, %v1197_v38 }
 0x299   :  { %v1958_v56 = vpop.permute.xlu1 %868  ;;  %v845_v19 = vpop.permute.xlu0 %844 }
 0x29a   :  { %v1081_v57 = vrot.slane %v845_v19, %v1719_v29 }
 0x29c   :  { %v1205_v34 = vsel %vm1165_vm6, %v1081_v57, %v1204_v12 }
 0x29d   :  { %v800_v58 = vpop.permute.xlu1 %799  ;;  %v893_v41 = vpop.permute.xlu0 %892 }
 0x29e   :  { %v1145_v63 = vrot.slane %v893_v41, %v1719_v29  ;;  %v1021_v4 = vrot.slane %v800_v58, %v1719_v29 }
 0x2a0   :  { %v1219_v7 = vsel %vm1165_vm6, %v1145_v63, %v1218_v53  ;;  %v1192_v24 = vsel %vm1167_vm7, %v1021_v4, %v1191_v40 }
 0x2a1   :  { %v848_v6 = vpop.permute.xlu1 %847  ;;  %v1962_v15 = vpop.permute.xlu0 %823 }
 0x2a2   :  { %v1085_v33 = vrot.slane %v848_v6, %v1719_v29  ;;  %v1053_v50 = vrot.slane %v1962_v15, %v1719_v29  ;;  %v1113_v6 = vrot.slane %v1958_v56, %v1719_v29 }
 0x2a4   :  { %v1206_v48 = vsel %vm1167_vm7, %v1085_v33, %v1205_v34 }
 0x2a5   :  { %v896_v14 = vpop.permute.xlu1 %895  ;;  %v1965_v60 = vpop.permute.xlu0 %871 }
 0x2a6   :  { %v1149_v20 = vrot.slane %v896_v14, %v1719_v29 }
 0x2a8   :  { %v1220_v1 = vsel %vm1167_vm7, %v1149_v20, %v1219_v7  ;;  %v1199_v20 = vsel %vm1167_vm7, %v1053_v50, %v1198_v25 }
 0x2a9   :  { %v1968_v9 = vpop.permute.xlu1 %826  ;;  %v803_v17 = vpop.permute.xlu0 %802 }
 0x2aa   :  { %v1025_v28 = vrot.slane %v803_v17, %v1719_v29  ;;  %v1057_v51 = vrot.slane %v1968_v9, %v1719_v29  ;;  %v1210_v17 = vsel %vm301_vm3, %v1105_v23, %v1101_v55 }
 0x2ac   :  { %v1193_v52 = vsel %vm1169_vm8, %v1025_v28, %v1192_v24 }
 0x2ad   :  { %v1970_v59 = vpop.permute.xlu1 %874  ;;  %v851_v21 = vpop.permute.xlu0 %850 }
 0x2ae   :  { %v1089_v35 = vrot.slane %v851_v21, %v1719_v29  ;;  %v1200_v21 = vsel %vm1169_vm8, %v1057_v51, %v1199_v20  ;;  %v1121_v56 = vrot.slane %v1970_v59, %v1719_v29 }
 0x2b0   :  { %v1207_v53 = vsel %vm1169_vm8, %v1089_v35, %v1206_v48 }
 0x2b1   :  { %v806_v0 = vpop.permute.xlu1 %805  ;;  %v899_v8 = vpop.permute.xlu0 %898 }
 0x2b2   :  { %v1153_v16 = vrot.slane %v899_v8, %v1719_v29  ;;  %v1029_v42 = vrot.slane %v806_v0, %v1719_v29  ;;  %v1211_v8 = vsel %vm1163_vm5, %v1109_v39, %v1210_v17 }
 0x2b4   :  { %v1221_v22 = vsel %vm1169_vm8, %v1153_v16, %v1220_v1  ;;  %v1194_v7 = vsel %vm1171_vm9, %v1029_v42, %v1193_v52  ;;  %v1117_v1 = vrot.slane %v1965_v60, %v1719_v29 }
 0x2b5   :  { %v854_v61 = vpop.permute.xlu1 %853  ;;  %v1974_v3 = vpop.permute.xlu0 %829 }
 0x2b6   :  { %v1093_v45 = vrot.slane %v854_v61, %v1719_v29  ;;  %v1061_v19 = vrot.slane %v1974_v3, %v1719_v29  ;;  %v1212_v3 = vsel %vm1165_vm6, %v1113_v6, %v1211_v8 }
 0x2b7   :  { %v1213_v47 = vsel %vm1167_vm7, %v1117_v1, %v1212_v3 }
 0x2b8   :  { %v1208_v14 = vsel %vm1171_vm9, %v1093_v45, %v1207_v53  ;;  %v1201_v61 = vsel %vm1171_vm9, %v1061_v19, %v1200_v21  ;;  %v1214_v49 = vsel %vm1169_vm8, %v1121_v56, %v1213_v47  ;;  %v1475_v47 = vld [vmem:[#allocation2 + $0x10] sm:$0xff] }
 0x2b9   :  { %v902_v2 = vpop.permute.xlu1 %901  ;;  %v1983_v31 = vpop.permute.xlu0 %877 }
 0x2ba   :  { %v1157_v13 = vrot.slane %v902_v2, %v1719_v29  ;;  %v1125_v16 = vrot.slane %v1983_v31, %v1719_v29 }
 0x2bc   :  { %v1995_v37 = vsel %vm1171_vm9, %v1157_v13, %v1221_v22  ;;  %v1215_v2 = vsel %vm1171_vm9, %v1125_v16, %v1214_v49  ;;  %v1427_v13 = vld [vmem:[%s2073_s4] ss:$0 sm:$0xff]  ;;  %s1539_s4 = smov [#allocation5]  }
 0x2bd   :  { %v809_v36 = vpop.permute.xlu1 %808  ;;  %v785_v44 = vpop.permute.xlu0 %784  ;;  %s1414_s10 = sshll.u32 %s1539_s4, 4  ;;  %s1415_s10 = int_to_ptr.vmem [resolvable:$true] %s1414_s10 }
 0x2be   :  { %v1033_v30 = vrot.slane %v809_v36, %v1719_v29  ;;  %v1001_v46 = vrot.slane %v785_v44, %v1719_v29  ;;  %s1511_s11 = scalar_lea.vmem %s1415_s10, 2048  ;;  %p1516_p6 = scmp.lt.s32.totalorder %s1415_s10, %s1415_s10 }
 0x2bf   :  { %p1512_p5 = scmp.ne.s32.totalorder %s1415_s10, %s1511_s11  ;;  %p1517_p7 = scmp.lt.s32.totalorder %s1511_s11, %s1511_s11 }
 0x2c0   :  { %v1188_v18 = vsel %vm1173_vm10, %v1001_v46, %v1935_v27  ;;  %v1195_v27 = vsel %vm1173_vm10, %v1033_v30, %v1194_v7 }
 0x2c1   :  { %v857_v54 = vpop.permute.xlu1 %856  ;;  %v833_v41 = vpop.permute.xlu0 %832  ;;  %v1239_v63 = vsel %vm1232_vm11, %v1188_v18, 0.0  ;;  %v1242_v60 = vsel %vm1232_vm11, %v1195_v27, 0.0  ;;  %p1518_p8 = por %p1517_p7, %p1516_p6 }
 0x2c2   :  { %v1097_v58 = vrot.slane %v857_v54, %v1719_v29  ;;  %v1065_v15 = vrot.slane %v833_v41, %v1719_v29  ;;  %1240 = vadd.xlane.f32.xlu0 %v1239_v63 }
 0x2c3   :  { %p1519_p9 = pnand %p1518_p8, %p1512_p5 }
 0x2c4   :  { %v1209_v9 = vsel %vm1173_vm10, %v1097_v58, %v1208_v14  ;;  %v1202_v59 = vsel %vm1173_vm10, %v1065_v15, %v1201_v61 }
 0x2c5   :  { %v1248_v0 = vsel %vm1232_vm11, %v1209_v9, 0.0  ;;  %v881_v22 = vpop.permute.xlu0 %880  ;;  %v1245_v10 = vsel %vm1232_vm11, %v1202_v59, 0.0  ;;  %v905_v31 = vpop.permute.xlu1 %904 }
 0x2c6   :  { %1249 = vadd.xlane.f32.xlu1 %v1248_v0  ;;  %v1129_v11 = vrot.slane %v881_v22, %v1719_v29  ;;  %1243 = vadd.xlane.f32.xlu0 %v1242_v60  ;;  %v1161_v55 = vrot.slane %v905_v31, %v1719_v29  ;;  %v1478_v31 = vld [vmem:[#allocation2 + $0x8] sm:$0xff] }
 0x2c8   :  { %v1216_v5 = vsel %vm1173_vm10, %v1129_v11, %v1215_v2  ;;  %v1223_v32 = vsel %vm1173_vm10, %v1161_v55, %v1995_v37 }
 0x2c9   :  { %v1251_v62 = vsel %vm1232_vm11, %v1216_v5, 0.0  ;;  %v1254_v23 = vsel %vm1232_vm11, %v1223_v32, 0.0 }
 0x2ca   :  { %1246 = vadd.xlane.f32.xlu0 %v1245_v10  ;;  %v1476_v10 = vld [vmem:[#allocation2 + $0x18] sm:$0xff] }
 0x2ce   :  { %1252 = vadd.xlane.f32.xlu0 %v1251_v62  ;;  %v1477_v62 = vld [vmem:[#allocation2] sm:$0xff] }
 0x2d7   :  { %1267 = vbcast.lane.b32.xlu1 %v1427_v13, 264 }
 0x2db   :  { %1271 = vbcast.lane.b32.xlu1 %v1427_v13, 272 }
 0x2e4   :  { %1263 = vbcast.lane.b32.xlu0 %v1427_v13, 256 }
 0x2f2   :  { %v1235_v57 = vpop.xlane.xlu0 %1234 }
 0x2f7   :  { %v1238_v26 = vpop.xlane.xlu1 %1237 }
 0x2ff   :  { %1255 = vadd.xlane.f32.xlu1 %v1254_v23  ;;  %v1479_v23 = vld [vmem:[#allocation2 + $0x20] sm:$0xff] }
 0x310   :  { %1275 = vbcast.lane.b32.xlu1 %v1427_v13, 280 }
 0x34b   :  { %v1241_v4 = vpop.xlane.xlu0 %1240 }
 0x34f   :  { %v1250_v33 = vpop.xlane.xlu1 %1249  ;;  %v1244_v43 = vpop.xlane.xlu0 %1243 }
 0x353   :  { %v1268_v12 = vpop.permute.xlu1 %1267  ;;  %v1247_v35 = vpop.xlane.xlu0 %1246 }
 0x354   :  { %v1282_v28 = vadd.f32 %v1268_v12, %v1238_v26  ;;  %v1286_v6 = vadd.f32 %v1268_v12, %v1250_v33  ;;  %v1480_v26 = vld [vmem:[#allocation2 + $0x28] sm:$0xff] }
 0x356   :  { %v1429_v36 = vmul.f32 -1.442695, %v1282_v28  ;;  %v1433_v27 = vmul.f32 -1.442695, %v1286_v6  ;;  %v1482_v28 = vld [vmem:[#allocation2 + $0x48] sm:$0xff] }
 0x357   :  { %v1272_v38 = vpop.permute.xlu1 %1271  ;;  %v1253_v29 = vpop.xlane.xlu0 %1252 }
 0x358   :  { %1443 = vpow2.f32 %v1429_v36  ;;  %v1283_v39 = vadd.f32 %v1272_v38, %v1241_v4  ;;  %v1287_v45 = vadd.f32 %v1272_v38, %v1253_v29  ;;  %v1483_v38 = vld [vmem:[#allocation2 + $0x60] sm:$0xff]  ;;  %v1484_v29 = vld [vmem:[#allocation2 + $0x68] sm:$0xff] }
 0x35a   :  { %v1430_v40 = vmul.f32 -1.442695, %v1283_v39  ;;  %v1434_v25 = vmul.f32 -1.442695, %v1287_v45 }
 0x35b   :  { %v1264_v42 = vpop.permute.xlu0 %1263 }
 0x35c   :  { %v1281_v37 = vadd.f32 %v1264_v42, %v1235_v57  ;;  %v1285_v44 = vadd.f32 %v1264_v42, %v1247_v35  ;;  %1445 = vpow2.f32 %v1430_v40 }
 0x35e   :  { %v1428_v34 = vmul.f32 -1.442695, %v1281_v37  ;;  %v1432_v30 = vmul.f32 -1.442695, %v1285_v44  ;;  %v1485_v37 = vld [vmem:[#allocation2 + $0x30] sm:$0xff] }
 0x360   :  { %1447 = vpow2.f32 %v1428_v34  ;;  %v1486_v34 = vld [vmem:[#allocation2 + $0x38] sm:$0xff] }
 0x361   :  { %1449 = vpow2.f32 %v1432_v30 }
 0x365   :  { %v1444_v46 = vpop.eup %1443 }
 0x366   :  { %v1314_v24 = vadd.f32 1.0, %v1444_v46  ;;  %v1487_v46 = vld [vmem:[#allocation2 + $0x50] sm:$0xff] }
 0x368   :  { %1451 = vrcp.f32 %v1314_v24  ;;  %v1488_v24 = vld [vmem:[#allocation2 + $0x58] sm:$0xff] }
 0x369   :  { %1453 = vpow2.f32 %v1434_v25  ;;  %v1446_v48 = vpop.eup %1445 }
 0x36a   :  { %v1315_v52 = vadd.f32 1.0, %v1446_v48 }
 0x36d   :  { %v1448_v50 = vpop.eup %1447 }
 0x36e   :  { %v1313_v51 = vadd.f32 1.0, %v1448_v50  ;;  %v1450_v53 = vpop.eup %1449 }
 0x36f   :  { %v1317_v18 = vadd.f32 1.0, %v1450_v53  ;;  %v1490_v53 = vld [vmem:[#allocation2 + $0x78] sm:$0xff] }
 0x370   :  { %1455 = vrcp.f32 %v1313_v51  ;;  %v1489_v51 = vld [vmem:[#allocation2 + $0x70] sm:$0xff] }
 0x371   :  { %1457 = vrcp.f32 %v1315_v52 }
 0x372   :  { %1459 = vrcp.f32 %v1317_v18 }
 0x375   :  { %v1452_v54 = vpop.eup %1451 }
 0x376   :  { %v1454_v19 = vpop.eup %1453  ;;  %1344 = vperm.xlu1 %1442, %v1452_v54  }
 0x377   :  { %v1319_v58 = vadd.f32 1.0, %v1454_v19 }
 0x379   :  { %1461 = vrcp.f32 %v1319_v58 }
 0x37a   :  { %1463 = vpow2.f32 %v1433_v27 }
 0x37d   :  { %v1456_v41 = vpop.eup %1455 }
 0x37e   :  { %1339 = vperm.xlu0 %1441, %v1456_v41   ;;  %v1458_v63 = vpop.eup %1457 }
 0x37f   :  { %v1460_v7 = vpop.eup %1459 }
 0x382   :  { %1349 = vperm.xlu0 %1441, %v1458_v63  }
 0x386   :  { %1359 = vperm.xlu0 %1441, %v1460_v7   ;;  %v1462_v14 = vpop.eup %1461 }
 0x387   :  { %v1464_v56 = vpop.eup %1463 }
 0x388   :  { %v1256_v15 = vpop.xlane.xlu1 %1255  ;;  %v1318_v16 = vadd.f32 1.0, %v1464_v56 }
 0x38a   :  { %1369 = vperm.xlu0 %1441, %v1462_v14  }
 0x38c   :  { %v1276_v20 = vpop.permute.xlu1 %1275 }
 0x38d   :  { %v1284_v1 = vadd.f32 %v1276_v20, %v1244_v43  ;;  %v1288_v9 = vadd.f32 %v1276_v20, %v1256_v15  ;;  %v1481_v43 = vld [vmem:[#allocation2 + $0x40] sm:$0xff] }
 0x38f   :  { %v1431_v17 = vmul.f32 -1.442695, %v1284_v1  ;;  %v1435_v21 = vmul.f32 -1.442695, %v1288_v9 }
 0x391   :  { %1465 = vpow2.f32 %v1431_v17 }
 0x392   :  { %1467 = vpow2.f32 %v1435_v21 }
 0x39e   :  { %v1466_v0 = vpop.eup %1465 }
 0x39f   :  { %v1316_v8 = vadd.f32 1.0, %v1466_v0  ;;  %v1468_v22 = vpop.eup %1467 }
 0x3a0   :  { %v1320_v60 = vadd.f32 1.0, %v1468_v22 }
 0x3a1   :  { %1469 = vrcp.f32 %v1316_v8 }
 0x3a2   :  { %1471 = vrcp.f32 %v1318_v16 }
 0x3a3   :  { %1473 = vrcp.f32 %v1320_v60 }
 0x3ae   :  { %v1470_v61 = vpop.eup %1469 }
 0x3af   :  { %1354 = vperm.xlu1 %1442, %v1470_v61   ;;  %v1472_v3 = vpop.eup %1471 }
 0x3b0   :  { %v1474_v11 = vpop.eup %1473 }
 0x3b3   :  { %1364 = vperm.xlu1 %1442, %v1472_v3  }
 0x3b7   :  { %1374 = vperm.xlu1 %1442, %v1474_v11  }
 0x3f1   :  { %v1345_v59 = vpop.permute.xlu1 %1344 }
 0x3f2   :  { %v1379_v49 = vmul.f32 %v1475_v47, %v1345_v59  ;;  %v1380_v2 = vmul.f32 %v1476_v10, %v1345_v59 }
 0x3f4   :  { %1395 = vst [vmem:[#allocation5 + $0x10] sm:$0xff] %v1379_v49  ;;  %1396 = vst [vmem:[#allocation5 + $0x18] sm:$0xff] %v1380_v2 }
 0x3f9   :  { %v1340_v5 = vpop.permute.xlu0 %1339 }
 0x3fa   :  { %v1377_v13 = vmul.f32 %v1477_v62, %v1340_v5  ;;  %v1378_v55 = vmul.f32 %v1478_v31, %v1340_v5 }
 0x3fc   :  { %1393 = vst [vmem:[#allocation5] sm:$0xff] %v1377_v13  ;;  %1394 = vst [vmem:[#allocation5 + $0x8] sm:$0xff] %v1378_v55 }
 0x3fd   :  { %v1350_v32 = vpop.permute.xlu0 %1349 }
 0x3fe   :  { %v1381_v57 = vmul.f32 %v1479_v23, %v1350_v32  ;;  %v1382_v4 = vmul.f32 %v1480_v26, %v1350_v32 }
 0x400   :  { %1397 = vst [vmem:[#allocation5 + $0x20] sm:$0xff] %v1381_v57  ;;  %1398 = vst [vmem:[#allocation5 + $0x28] sm:$0xff] %v1382_v4 }
 0x401   :  { %v1360_v33 = vpop.permute.xlu0 %1359 }
 0x402   :  { %v1385_v12 = vmul.f32 %v1481_v43, %v1360_v33  ;;  %v1386_v35 = vmul.f32 %v1482_v28, %v1360_v33 }
 0x404   :  { %1401 = vst [vmem:[#allocation5 + $0x40] sm:$0xff] %v1385_v12  ;;  %1402 = vst [vmem:[#allocation5 + $0x48] sm:$0xff] %v1386_v35 }
 0x405   :  { %v1370_v36 = vpop.permute.xlu0 %1369 }
 0x406   :  { %v1389_v39 = vmul.f32 %v1483_v38, %v1370_v36  ;;  %v1390_v40 = vmul.f32 %v1484_v29, %v1370_v36 }
 0x408   :  { %1405 = vst [vmem:[#allocation5 + $0x60] sm:$0xff] %v1389_v39  ;;  %1406 = vst [vmem:[#allocation5 + $0x68] sm:$0xff] %v1390_v40 }
 0x42a   :  { %v1355_v42 = vpop.permute.xlu1 %1354 }
 0x42b   :  { %v1383_v44 = vmul.f32 %v1485_v37, %v1355_v42  ;;  %v1384_v45 = vmul.f32 %v1486_v34, %v1355_v42 }
 0x42d   :  { %1399 = vst [vmem:[#allocation5 + $0x30] sm:$0xff] %v1383_v44  ;;  %1400 = vst [vmem:[#allocation5 + $0x38] sm:$0xff] %v1384_v45 }
 0x42e   :  { %v1365_v30 = vpop.permute.xlu1 %1364 }
 0x42f   :  { %v1387_v25 = vmul.f32 %v1487_v46, %v1365_v30  ;;  %v1388_v48 = vmul.f32 %v1488_v24, %v1365_v30 }
 0x431   :  { %1403 = vst [vmem:[#allocation5 + $0x50] sm:$0xff] %v1387_v25  ;;  %1404 = vst [vmem:[#allocation5 + $0x58] sm:$0xff] %v1388_v48 }
 0x432   :  { %v1375_v50 = vpop.permute.xlu1 %1374 }
 0x433   :  { %v1391_v52 = vmul.f32 %v1489_v51, %v1375_v50  ;;  %v1392_v54 = vmul.f32 %v1490_v53, %v1375_v50 }
 0x435   :  { %1407 = vst [vmem:[#allocation5 + $0x70] sm:$0xff] %v1391_v52  ;;  %1408 = vst [vmem:[#allocation5 + $0x78] sm:$0xff] %v1392_v54 }
 0x436   :  { %1522 = shalt.err (!%p1519_p9)
}
 0x437   :  { %1420 = dma.vmem_to_hbm [thread:$0]  %s1415_s10, 2048, %s2074_s5, [#allocation4], %s1536_s21, %s1536_s21, %s1537_s22  }
 0x438   :  { %1533 = dma.done.wait [#allocation4], 2048  }
 0x439   :  { %1534 = vsyncadd [#allocation4], 4294965248 }
 0x43a   :  { %1424 = vsyncpa [#allocation3], 1 }
 0x43b   :  { %1425 = vsyncpa [#allocation4], 1 }

</bundles_post_ra>
